<compile_context>
chip_gen: v5e
topology: v5e:2x2
jax: 0.10.0
libtpu: 0.0.40
codegen_flags: <defaults>
</compile_context>

<pallas_src>
import jax
import jax.numpy as jnp
from jax.experimental import pallas as pl
from jax.experimental.pallas import tpu as pltpu


def _round_up(x, m):
    return ((x + m - 1) // m) * m


def _vmem_capacity_bytes():
    """Physical VMEM per TensorCore; conservative fallback if unqueryable."""
    try:
        info = pltpu.get_tpu_info()
        cap = int(getattr(info, "vmem_capacity_bytes", 0))
        if cap > 0:
            return cap
    except Exception:
        pass
    return 64 * 1024 * 1024  # v7x per-TC size; safe lower bound for v5e/v6e.


def adapter_kernel(x_ref, w1_ref, w2_ref, o_ref):
    # Cast x to the MXU dtype here (VPU) so HBM carries x only once.
    x = x_ref[...].astype(w1_ref.dtype)
    # First linear + ReLU: MXU matmul (bf16 in, f32 accumulate), VPU max.
    h = jnp.dot(x, w1_ref[...], preferred_element_type=jnp.float32)
    h = jnp.maximum(h, 0.0)
    # Second linear + ReLU. Intermediate stays fused in VMEM/vregs.
    y = jnp.dot(h.astype(w2_ref.dtype), w2_ref[...],
                preferred_element_type=jnp.float32)
    o_ref[...] = jnp.maximum(y, 0.0).astype(o_ref.dtype)


def prepare_adapter_weights(w1, w2, compute_dtype=jnp.bfloat16):
    """One-time weight prep: transpose to (in, out), cast, zero-pad to 128.

    w1: (hidden, c_in)  -- PyTorch nn.Linear layout (out_features, in_features)
    w2: (c_in, hidden)
    Zero padding is exact: padded input features hit zero weight rows, padded
    hidden/output columns stay zero through ReLU and are sliced off.
    """
    hidden, c_in = w1.shape
    assert w2.shape == (c_in, hidden)
    c_in_p = _round_up(c_in, 128)
    hidden_p = _round_up(hidden, 128)
    w1_t = jnp.pad(w1.T.astype(compute_dtype),
                   ((0, c_in_p - c_in), (0, hidden_p - hidden)))
    w2_t = jnp.pad(w2.T.astype(compute_dtype),
                   ((0, hidden_p - hidden), (0, c_in_p - c_in)))
    return w1_t, w2_t


def _select_tiles(c_in_p, hidden_p, x_b, w_b, out_b, budget):
    """Pick (tm, tn): row tile and output-column tile (tn divides c_in_p)."""
    w1_bytes = c_in_p * hidden_p * w_b                 # resident, single-buffered

    def fits(tm, tn):
        w2_bytes = hidden_p * tn * w_b                 # resident, single-buffered
        x_tile = 2 * tm * c_in_p * x_b                 # double-buffered input tile
        o_tile = 2 * tm * tn * out_b                   # double-buffered output tile
        # Intermediates: bf16 cast of x, h (f32 + bf16 cast), pre-cast f32 result.
        interm = tm * c_in_p * w_b + tm * hidden_p * (4 + w_b) + tm * tn * 4
        return w1_bytes + w2_bytes + x_tile + o_tile + interm <= budget

    # 128-multiple divisors of c_in_p, largest first (lane-dense output blocks).
    tn_candidates = [d for d in range(c_in_p, 127, -128) if c_in_p % d == 0]
    tm_candidates = (512, 384, 256, 192, 128, 64, 32, 16)
    for tn in tn_candidates:
        for tm in tm_candidates:
            if fits(tm, tn):
                return tm, tn
    return 16, 128  # last resort; vmem_limit_bytes still bounds usage


def adapter_forward_prepared(x, w1_t, w2_t, *, out_dtype=None, tm=None, tn=None,
                             vmem_limit_bytes=None):
    """Fused Adapter forward using weights from `prepare_adapter_weights`.

    x: (..., c_in); w1_t: (c_in_p, hidden_p); w2_t: (hidden_p, c_in_p).
    out_dtype=jnp.bfloat16 cuts output HBM traffic ~2x if the consumer allows.
    """
    orig_shape = x.shape
    c_in = orig_shape[-1]
    c_in_p, hidden_p = w1_t.shape
    out_dtype = x.dtype if out_dtype is None else out_dtype

    x2 = x.reshape(-1, c_in)
    N = x2.shape[0]

    # Only pad the feature (lane) dim, and only when needed; never pad batch.
    if c_in_p != c_in:
        x2 = jnp.pad(x2, ((0, 0), (0, c_in_p - c_in)))

    # ---- VMEM sizing (generation-derived: 64 MiB on v7x, 128 MiB v5e/v6e). ----
    cap = _vmem_capacity_bytes()
    if vmem_limit_bytes is None:
        vmem_limit_bytes = min(cap - 16 * 1024 * 1024, 112 * 1024 * 1024)
    vmem_limit_bytes = int(min(vmem_limit_bytes, cap - 8 * 1024 * 1024))
    budget = vmem_limit_bytes - 4 * 1024 * 1024  # headroom for internal scratch

    x_b = jnp.dtype(x2.dtype).itemsize
    w_b = jnp.dtype(w1_t.dtype).itemsize
    out_b = jnp.dtype(out_dtype).itemsize

    sel_tm, sel_tn = _select_tiles(c_in_p, hidden_p, x_b, w_b, out_b, budget)
    tm = sel_tm if tm is None else max(16, (int(tm) // 16) * 16)
    tn = sel_tn if tn is None else max(128, (int(tn) // 128) * 128)
    tn = min(tn, c_in_p)
    n_col = pl.cdiv(c_in_p, tn)

    # ---- Megacore-friendly row tiling (v7x has 2 TCs under "parallel"). ----
    if N <= tm:
        if n_col < 2 and N >= 512:
            tm = _round_up(pl.cdiv(N, 2), 16)   # two balanced row tiles
        else:
            tm = N                              # full-height block (always legal)
    else:
        steps = pl.cdiv(N, tm)
        if n_col % 2 == 1 and steps > 1 and steps % 2 == 1:
            tm2 = _round_up(pl.cdiv(N, steps + 1), 16)
            if tm2 >= 64:
                tm = tm2                        # prefer an even number of row tiles
    grid = (pl.cdiv(N, tm), n_col)

    def build(single_buffer_weights):
        w_kw = dict(pipeline_mode=pl.Buffered(1)) if single_buffer_weights else {}
        return pl.pallas_call(
            adapter_kernel,
            out_shape=jax.ShapeDtypeStruct((N, c_in_p), out_dtype),
            grid_spec=pltpu.PrefetchScalarGridSpec(
                num_scalar_prefetch=0,
                grid=grid,
                in_specs=[
                    pl.BlockSpec((tm, c_in_p), lambda i, j: (i, 0)),
                    pl.BlockSpec((c_in_p, hidden_p), lambda i, j: (0, 0), **w_kw),
                    pl.BlockSpec((hidden_p, tn), lambda i, j: (0, j), **w_kw),
                ],
                out_specs=pl.BlockSpec((tm, tn), lambda i, j: (i, j)),
            ),
            compiler_params=pltpu.CompilerParams(
                dimension_semantics=("parallel", "parallel"),
                vmem_limit_bytes=vmem_limit_bytes),
        )

    try:
        out = build(True)(x2, w1_t, w2_t)
    except Exception:
        # TODO(synk): some jax builds may reject pipeline_mode on pallas_call
        # BlockSpecs; fall back to default double-buffered weights.
        out = build(False)(x2, w1_t, w2_t)

    if c_in_p != c_in:
        out = out[:, :c_in]
    return out.reshape(orig_shape)


def adapter_forward(x, w1, w2, *, compute_dtype=jnp.bfloat16, **kwargs):
    """Convenience path: prepares weights on every call. For repeated inference
    call prepare_adapter_weights once and use adapter_forward_prepared."""
    w1_t, w2_t = prepare_adapter_weights(w1, w2, compute_dtype)
    return adapter_forward_prepared(x, w1_t, w2_t, **kwargs)


if __name__ == "__main__":
    # Small shapes consistent with the module: batch=8, c_in=32, reduction=4.
    N, c_in, reduction = 8, 32, 4
    hidden = c_in // reduction

    key = jax.random.PRNGKey(0)
    kx, k1, k2 = jax.random.split(key, 3)

    x = jax.random.normal(kx, (N, c_in), dtype=jnp.float32)
    # PyTorch nn.Linear weights are (out_features, in_features).
    w1 = jax.random.normal(k1, (hidden, c_in), dtype=jnp.float32) * (1.0 / c_in ** 0.5)
    w2 = jax.random.normal(k2, (c_in, hidden), dtype=jnp.float32) * (1.0 / hidden ** 0.5)

    # Prepare (pad/transpose/cast) the static adapter weights ONCE.
    w1_t, w2_t = prepare_adapter_weights(w1, w2)
    y = adapter_forward_prepared(x, w1_t, w2_t)
    jax.block_until_ready(y)
    assert y.shape == x.shape and y.dtype == x.dtype

    # Reference emulating the kernel's bf16-input / f32-accumulate arithmetic.
    xb = x.astype(jnp.bfloat16).astype(jnp.float32)
    w1b = w1.astype(jnp.bfloat16).astype(jnp.float32)
    w2b = w2.astype(jnp.bfloat16).astype(jnp.float32)
    h = jnp.maximum(xb @ w1b.T, 0.0)
    hb = h.astype(jnp.bfloat16).astype(jnp.float32)
    ref_bf16 = jnp.maximum(hb @ w2b.T, 0.0)
    assert jnp.allclose(y, ref_bf16, atol=2e-2, rtol=2e-2), "mismatch vs bf16 reference"

    # Looser check against the pure-f32 PyTorch-equivalent reference.
    ref_f32 = jnp.maximum(jnp.maximum(x @ w1.T, 0.0) @ w2.T, 0.0)
    assert jnp.allclose(y, ref_f32, atol=6e-2, rtol=6e-2), "mismatch vs f32 reference"

    print("KERNEL_OK")
</pallas_src>

<mosaic_0001>
module attributes {stable_mosaic.version = 11 : i64} {
  func.func @adapter_kernel(%arg0: i32, %arg1: i32, %arg2: memref<8x128xf32, #tpu.memory_space<vmem>>, %arg3: memref<128x128xbf16, #tpu.memory_space<vmem>>, %arg4: memref<128x128xbf16, #tpu.memory_space<vmem>>, %arg5: memref<8x128xf32, #tpu.memory_space<vmem>>) attributes {dimension_semantics = [#tpu.dimension_semantics<parallel>, #tpu.dimension_semantics<parallel>], iteration_bounds = array<i64: 1, 1>, scalar_prefetch = 0 : i64, scratch_operands = 0 : i64, tpu.core_type = #tpu.core_type<tc>, window_params = [{transform_indices = @transform_0, window_bounds = array<i64: 8, 128>}, {pipeline_mode = #tpu.pipeline_mode<synchronous>, transform_indices = @transform_1, window_bounds = array<i64: 128, 128>}, {pipeline_mode = #tpu.pipeline_mode<synchronous>, transform_indices = @transform_2, window_bounds = array<i64: 128, 128>}, {transform_indices = @transform_3, window_bounds = array<i64: 8, 128>}]} {
    %c0 = arith.constant 0 : index
    %c0_0 = arith.constant 0 : index
    %0 = vector.load %arg2[%c0, %c0_0] : memref<8x128xf32, #tpu.memory_space<vmem>>, vector<8x128xf32>
    %1 = arith.truncf %0 : vector<8x128xf32> to vector<8x128xbf16>
    %c0_1 = arith.constant 0 : index
    %c0_2 = arith.constant 0 : index
    %2 = vector.load %arg3[%c0_1, %c0_2] : memref<128x128xbf16, #tpu.memory_space<vmem>>, vector<128x128xbf16>
    %cst = arith.constant dense<0.000000e+00> : vector<8x128xf32>
    %3 = tpu.matmul %1, %2, %cst {dimension_numbers = #tpu.dot_dimension_numbers<[1], [0], [0], [1], [0, 0, 1, 1], [], []>} : vector<8x128xbf16>, vector<128x128xbf16>, vector<8x128xf32> -> vector<8x128xf32>
    %cst_3 = arith.constant 0.000000e+00 : f32
    %4 = vector.broadcast %cst_3 : f32 to vector<8x128xf32>
    %5 = arith.maximumf %3, %4 : vector<8x128xf32>
    %6 = arith.truncf %5 : vector<8x128xf32> to vector<8x128xbf16>
    %c0_4 = arith.constant 0 : index
    %c0_5 = arith.constant 0 : index
    %7 = vector.load %arg4[%c0_4, %c0_5] : memref<128x128xbf16, #tpu.memory_space<vmem>>, vector<128x128xbf16>
    %cst_6 = arith.constant dense<0.000000e+00> : vector<8x128xf32>
    %8 = tpu.matmul %6, %7, %cst_6 {dimension_numbers = #tpu.dot_dimension_numbers<[1], [0], [0], [1], [0, 0, 1, 1], [], []>} : vector<8x128xbf16>, vector<128x128xbf16>, vector<8x128xf32> -> vector<8x128xf32>
    %cst_7 = arith.constant 0.000000e+00 : f32
    %9 = vector.broadcast %cst_7 : f32 to vector<8x128xf32>
    %10 = arith.maximumf %8, %9 : vector<8x128xf32>
    %c0_8 = arith.constant 0 : index
    %c0_9 = arith.constant 0 : index
    %11 = vector.load %arg5[%c0_8, %c0_9] : memref<8x128xf32, #tpu.memory_space<vmem>>, vector<8x128xf32>
    tpu.vector_store %arg5[%c0_8, %c0_9], %10 {strides = array<i32>} : memref<8x128xf32, #tpu.memory_space<vmem>>, vector<8x128xf32>,
    return
  }
  func.func @transform_0(%arg0: i32, %arg1: i32) -> (i32, i32) {
    %c0_i32 = arith.constant 0 : i32
    %c0_i32_0 = arith.constant 0 : i32
    return %arg0, %c0_i32 : i32, i32
  }
  func.func @transform_1(%arg0: i32, %arg1: i32) -> (i32, i32) {
    %c0_i32 = arith.constant 0 : i32
    %c0_i32_0 = arith.constant 0 : i32
    %c0_i32_1 = arith.constant 0 : i32
    return %c0_i32, %c0_i32_0 : i32, i32
  }
  func.func @transform_2(%arg0: i32, %arg1: i32) -> (i32, i32) {
    %c0_i32 = arith.constant 0 : i32
    %c0_i32_0 = arith.constant 0 : i32
    return %c0_i32, %arg1 : i32, i32
  }
  func.func @transform_3(%arg0: i32, %arg1: i32) -> (i32, i32) {
    %c0_i32 = arith.constant 0 : i32
    return %arg0, %arg1 : i32, i32
  }
}

module attributes {stable_mosaic.version = 11 : i64} {
  func.func @adapter_kernel(%arg0: i32, %arg1: i32, %arg2: memref<8x128xf32, #tpu.memory_space<vmem>>, %arg3: memref<128x128xbf16, #tpu.memory_space<vmem>>, %arg4: memref<128x128xbf16, #tpu.memory_space<vmem>>, %arg5: memref<8x128xf32, #tpu.memory_space<vmem>>) attributes {dimension_semantics = [#tpu.dimension_semantics<parallel>, #tpu.dimension_semantics<parallel>], iteration_bounds = array<i64: 1, 1>, scalar_prefetch = 0 : i64, scratch_operands = 0 : i64, tpu.core_type = #tpu.core_type<tc>, window_params = [{transform_indices = @transform_0, window_bounds = array<i64: 8, 128>}, {pipeline_mode = #tpu.pipeline_mode<synchronous>, transform_indices = @transform_1, window_bounds = array<i64: 128, 128>}, {transform_indices = @transform_2, window_bounds = array<i64: 128, 128>}, {transform_indices = @transform_3, window_bounds = array<i64: 8, 128>}]} {
    %c0 = arith.constant 0 : index
    %c0_0 = arith.constant 0 : index
    %0 = vector.load %arg2[%c0, %c0_0] : memref<8x128xf32, #tpu.memory_space<vmem>>, vector<8x128xf32>
    %1 = arith.truncf %0 : vector<8x128xf32> to vector<8x128xbf16>
    %c0_1 = arith.constant 0 : index
    %c0_2 = arith.constant 0 : index
    %2 = vector.load %arg3[%c0_1, %c0_2] : memref<128x128xbf16, #tpu.memory_space<vmem>>, vector<128x128xbf16>
    %cst = arith.constant dense<0.000000e+00> : vector<8x128xf32>
    %3 = tpu.matmul %1, %2, %cst {dimension_numbers = #tpu.dot_dimension_numbers<[1], [0], [0], [1], [0, 0, 1, 1], [], []>} : vector<8x128xbf16>, vector<128x128xbf16>, vector<8x128xf32> -> vector<8x128xf32>
    %cst_3 = arith.constant 0.000000e+00 : f32
    %4 = vector.broadcast %cst_3 : f32 to vector<8x128xf32>
    %5 = arith.maximumf %3, %4 : vector<8x128xf32>
    %6 = arith.truncf %5 : vector<8x128xf32> to vector<8x128xbf16>
    %c0_4 = arith.constant 0 : index
    %c0_5 = arith.constant 0 : index
    %7 = vector.load %arg4[%c0_4, %c0_5] : memref<128x128xbf16, #tpu.memory_space<vmem>>, vector<128x128xbf16>
    %cst_6 = arith.constant dense<0.000000e+00> : vector<8x128xf32>
    %8 = tpu.matmul %6, %7, %cst_6 {dimension_numbers = #tpu.dot_dimension_numbers<[1], [0], [0], [1], [0, 0, 1, 1], [], []>} : vector<8x128xbf16>, vector<128x128xbf16>, vector<8x128xf32> -> vector<8x128xf32>
    %cst_7 = arith.constant 0.000000e+00 : f32
    %9 = vector.broadcast %cst_7 : f32 to vector<8x128xf32>
    %10 = arith.maximumf %8, %9 : vector<8x128xf32>
    %c0_8 = arith.constant 0 : index
    %c0_9 = arith.constant 0 : index
    %11 = vector.load %arg5[%c0_8, %c0_9] : memref<8x128xf32, #tpu.memory_space<vmem>>, vector<8x128xf32>
    tpu.vector_store %arg5[%c0_8, %c0_9], %10 {strides = array<i32>} : memref<8x128xf32, #tpu.memory_space<vmem>>, vector<8x128xf32>,
    return
  }
  func.func @transform_0(%arg0: i32, %arg1: i32) -> (i32, i32) {
    %c0_i32 = arith.constant 0 : i32
    %c0_i32_0 = arith.constant 0 : i32
    return %arg0, %c0_i32 : i32, i32
  }
  func.func @transform_1(%arg0: i32, %arg1: i32) -> (i32, i32) {
    %c0_i32 = arith.constant 0 : i32
    %c0_i32_0 = arith.constant 0 : i32
    %c0_i32_1 = arith.constant 0 : i32
    return %c0_i32, %c0_i32_0 : i32, i32
  }
  func.func @transform_2(%arg0: i32, %arg1: i32) -> (i32, i32) {
    %c0_i32 = arith.constant 0 : i32
    %c0_i32_0 = arith.constant 0 : i32
    return %c0_i32, %arg1 : i32, i32
  }
  func.func @transform_3(%arg0: i32, %arg1: i32) -> (i32, i32) {
    %c0_i32 = arith.constant 0 : i32
    return %arg0, %arg1 : i32, i32
  }
}

</mosaic_0001>

<bundles_post_ra>
// kernel: tpu_custom_call.1
= control target key start
LH: loop header
LB: loop body
LE: loop exit
PB: predicated region body
PF: predicated region fallthrough
CT: control target
= control target key end

     0   :  { %8 = vsyncpa [#allocation3], 0  ;;  %s464_s0 = inlined_call_operand.hbm [shape: f32[8,128], index: 0, kind: input, shape index: {}]   ;;  %s465_s1 = inlined_call_operand.hbm [shape: bf16[128,128], index: 1, kind: input, shape index: {}]   ;;  %s466_s2 = inlined_call_operand.hbm [shape: bf16[128,128], index: 2, kind: input, shape index: {}]   ;;  %s467_s3 = inlined_call_operand.hbm [shape: f32[8,128], index: 3, kind: output, shape index: {}]  }
   0x1   :  { %9 = vsyncpa [#allocation6], 0  ;;  %s26_s14 = sshll.u32 %s465_s1, 4  ;;  %s27_s14 = int_to_ptr.hbm [resolvable:$true] %s26_s14 }
   0x2   :  { %10 = vsyncpa [#allocation4], 0  ;;  %s426_s15 = smov [#allocation5]   ;;  %s16_s19 = sshll.u32 %s464_s0, 4  ;;  %s17_s19 = int_to_ptr.hbm [resolvable:$true] %s16_s19 }
   0x3   :  { %s28_s16 = sshll.u32 %s426_s15, 4  ;;  %s427_s20 = smov 64   ;;  %s29_s16 = int_to_ptr.vmem [resolvable:$true] %s28_s16 }
   0x4   :  { %s428_s21 = smov 4   ;;  %s429_s22 = smov [#allocation2]  }
   0x5   :  { %34 = dma.hbm_to_vmem [thread:$0]  %s27_s14, 1024, %s29_s16, [#allocation6], %s427_s20, %s427_s20, %s428_s21  }
   0x6   :  { %s18_s23 = sshll.u32 %s429_s22, 4  ;;  %s39_s26 = sshll.u32 %s466_s2, 4  ;;  %s19_s23 = int_to_ptr.vmem [resolvable:$true] %s18_s23  ;;  %s40_s26 = int_to_ptr.hbm [resolvable:$true] %s39_s26 }
   0x7   :  { %21 = dma.hbm_to_vmem [thread:$0]  %s17_s19, 128, %s19_s23, [#allocation3]  }
   0x8   :  { %s430_s1 = smov [#allocation7]  }
   0x9   :  { %s41_s27 = sshll.u32 %s430_s1, 4  ;;  %s42_s27 = int_to_ptr.vmem [resolvable:$true] %s41_s27 }
   0xa   :  { %47 = dma.hbm_to_vmem [thread:$0]  %s40_s26, 1024, %s42_s27, [#allocation6], %s427_s20, %s427_s20, %s428_s21  }
   0xb   :  { %420 = dma.done.wait [#allocation3], 128  }
   0xc   :  { %421 = vsyncadd [#allocation3], 4294967168 }
   0xd   :  { %422 = dma.done.wait [#allocation6], 2048  }
   0xe   :  { %423 = vsyncadd [#allocation6], 4294965248  ;;  %v309_v0 = vld [vmem:[#allocation5 + $0x38] sm:$0xff]  ;;  %v308_v1 = vld [vmem:[#allocation5 + $0x30] sm:$0xff]  ;;  %s431_s0 = smov [#allocation8]   ;;  %s227_s30 = sshll.u32 %s467_s3, 4  ;;  %s228_s30 = int_to_ptr.hbm [resolvable:$true] %s227_s30 }
   0xf   :  { %126 = vmatpush.bf16.msra.mxu0 %v309_v0  ;;  %v317_v2 = vld [vmem:[#allocation7 + $0x38] sm:$0xff]  ;;  %v316_v3 = vld [vmem:[#allocation7 + $0x30] sm:$0xff]  ;;  %v307_v4 = vld [vmem:[#allocation5 + $0x28] sm:$0xff]  ;;  %s225_s2 = sshll.u32 %s431_s0, 4  ;;  %s226_s2 = int_to_ptr.vmem [resolvable:$true] %s225_s2 }
  0x10   :  { %205 = vmatpush.bf16.msra.mxu1 %v317_v2  ;;  %v315_v5 = vld [vmem:[#allocation7 + $0x28] sm:$0xff]  ;;  %v306_v6 = vld [vmem:[#allocation5 + $0x20] sm:$0xff]  ;;  %v305_v8 = vld [vmem:[#allocation5 + $0x18] sm:$0xff] }
  0x11   :  { %v314_v7 = vld [vmem:[#allocation7 + $0x20] sm:$0xff]  ;;  %v313_v9 = vld [vmem:[#allocation7 + $0x18] sm:$0xff]  ;;  %v304_v10 = vld [vmem:[#allocation5 + $0x10] sm:$0xff] }
  0x12   :  { %v312_v11 = vld [vmem:[#allocation7 + $0x10] sm:$0xff]  ;;  %v303_v12 = vld [vmem:[#allocation5 + $0x8] sm:$0xff]  ;;  %v302_v14 = vld [vmem:[#allocation5] sm:$0xff] }
  0x13   :  { %127 = vmatpush.bf16.msra.mxu0 %v308_v1  ;;  %v311_v13 = vld [vmem:[#allocation7 + $0x8] sm:$0xff]  ;;  %v60_v15 = vld [vmem:[#allocation2] sm:$0xff]  ;;  %v310_v17 = vld [vmem:[#allocation7] sm:$0xff] }
  0x14   :  { %206 = vmatpush.bf16.msra.mxu1 %v316_v3  ;;  %v61_v16 = vpack.c.bf16 %v60_v15, %v60_v15 }
  0x17   :  { %128 = vmatpush.bf16.msra.mxu0 %v307_v4 }
  0x18   :  { %207 = vmatpush.bf16.msra.mxu1 %v315_v5 }
  0x1b   :  { %129 = vmatpush.bf16.msra.mxu0 %v306_v6 }
  0x1c   :  { %208 = vmatpush.bf16.msra.mxu1 %v314_v7 }
  0x1f   :  { %130 = vmatpush.bf16.msra.mxu0 %v305_v8 }
  0x20   :  { %209 = vmatpush.bf16.msra.mxu1 %v313_v9 }
  0x23   :  { %131 = vmatpush.bf16.msra.mxu0 %v304_v10 }
  0x24   :  { %210 = vmatpush.bf16.msra.mxu1 %v312_v11 }
  0x27   :  { %132 = vmatpush.bf16.msra.mxu0 %v303_v12 }
  0x28   :  { %211 = vmatpush.bf16.msra.mxu1 %v311_v13 }
  0x2b   :  { %133 = vmatpush.bf16.msra.mxu0 %v302_v14 }
  0x2c   :  { %212 = vmatpush.bf16.msra.mxu1 %v310_v17 }
  0x2e   :  { %134 = vmatmul.bf16.vlgmr.msra.gmra.mxu0 %v61_v16 }
  0xab   :  { %v135_v18 = vpop.f32.mrf.mxu0 }
  0xac   :  { %v139_v19 = vmax.f32 %v135_v18, 0.0 }
  0xae   :  { %v140_v20 = vpack.c.bf16 %v139_v19, %v139_v19 }
  0xb0   :  { %213 = vmatmul.bf16.vlgmr.msra.gmra.mxu1 %v140_v20 }
  0xb3   :  { %v137_v21 = vpop.f32.mrf.mxu0 }
 0x12d   :  { %v214_v22 = vpop.f32.mrf.mxu1 }
 0x12e   :  { %v218_v23 = vmax.f32 %v214_v22, 0.0 }
 0x130   :  { %219 = vst [vmem:[#allocation8] sm:$0xff] %v218_v23 }
 0x131   :  { %230 = dma.vmem_to_hbm [thread:$0]  %s226_s2, 128, %s228_s30, [#allocation4]  }
 0x135   :  { %v216_v24 = vpop.f32.mrf.mxu1 }
 0x136   :  { %424 = dma.done.wait [#allocation4], 128  }
 0x137   :  { %425 = vsyncadd [#allocation4], 4294967168 }
 0x138   :  { %235 = vsyncpa [#allocation3], 1 }
 0x139   :  { %236 = vsyncpa [#allocation6], 1 }
 0x13a   :  { %237 = vsyncpa [#allocation4], 1 }

// kernel: tpu_custom_call.1
= control target key start
LH: loop header
LB: loop body
LE: loop exit
PB: predicated region body
PF: predicated region fallthrough
CT: control target
= control target key end

     0   :  { %8 = vsyncpa [#allocation3], 0  ;;  %s464_s0 = inlined_call_operand.hbm [shape: f32[8,128], index: 0, kind: input, shape index: {}]   ;;  %s465_s1 = inlined_call_operand.hbm [shape: bf16[128,128], index: 1, kind: input, shape index: {}]   ;;  %s466_s2 = inlined_call_operand.hbm [shape: bf16[128,128], index: 2, kind: input, shape index: {}]   ;;  %s467_s3 = inlined_call_operand.hbm [shape: f32[8,128], index: 3, kind: output, shape index: {}]  }
   0x1   :  { %9 = vsyncpa [#allocation6], 0  ;;  %s26_s14 = sshll.u32 %s465_s1, 4  ;;  %s27_s14 = int_to_ptr.hbm [resolvable:$true] %s26_s14 }
   0x2   :  { %10 = vsyncpa [#allocation4], 0  ;;  %s426_s15 = smov [#allocation5]   ;;  %s16_s19 = sshll.u32 %s464_s0, 4  ;;  %s17_s19 = int_to_ptr.hbm [resolvable:$true] %s16_s19 }
   0x3   :  { %s28_s16 = sshll.u32 %s426_s15, 4  ;;  %s427_s20 = smov 64   ;;  %s29_s16 = int_to_ptr.vmem [resolvable:$true] %s28_s16 }
   0x4   :  { %s428_s21 = smov 4   ;;  %s429_s22 = smov [#allocation2]  }
   0x5   :  { %34 = dma.hbm_to_vmem [thread:$0]  %s27_s14, 1024, %s29_s16, [#allocation6], %s427_s20, %s427_s20, %s428_s21  }
   0x6   :  { %s18_s23 = sshll.u32 %s429_s22, 4  ;;  %s39_s26 = sshll.u32 %s466_s2, 4  ;;  %s19_s23 = int_to_ptr.vmem [resolvable:$true] %s18_s23  ;;  %s40_s26 = int_to_ptr.hbm [resolvable:$true] %s39_s26 }
   0x7   :  { %21 = dma.hbm_to_vmem [thread:$0]  %s17_s19, 128, %s19_s23, [#allocation3]  }
   0x8   :  { %s430_s1 = smov [#allocation7]  }
   0x9   :  { %s41_s27 = sshll.u32 %s430_s1, 4  ;;  %s42_s27 = int_to_ptr.vmem [resolvable:$true] %s41_s27 }
   0xa   :  { %47 = dma.hbm_to_vmem [thread:$0]  %s40_s26, 1024, %s42_s27, [#allocation6], %s427_s20, %s427_s20, %s428_s21  }
   0xb   :  { %420 = dma.done.wait [#allocation3], 128  }
   0xc   :  { %421 = vsyncadd [#allocation3], 4294967168 }
   0xd   :  { %422 = dma.done.wait [#allocation6], 2048  }
   0xe   :  { %423 = vsyncadd [#allocation6], 4294965248  ;;  %v309_v0 = vld [vmem:[#allocation5 + $0x38] sm:$0xff]  ;;  %v308_v1 = vld [vmem:[#allocation5 + $0x30] sm:$0xff]  ;;  %s431_s0 = smov [#allocation8]   ;;  %s227_s30 = sshll.u32 %s467_s3, 4  ;;  %s228_s30 = int_to_ptr.hbm [resolvable:$true] %s227_s30 }
   0xf   :  { %126 = vmatpush.bf16.msra.mxu0 %v309_v0  ;;  %v317_v2 = vld [vmem:[#allocation7 + $0x38] sm:$0xff]  ;;  %v316_v3 = vld [vmem:[#allocation7 + $0x30] sm:$0xff]  ;;  %v307_v4 = vld [vmem:[#allocation5 + $0x28] sm:$0xff]  ;;  %s225_s2 = sshll.u32 %s431_s0, 4  ;;  %s226_s2 = int_to_ptr.vmem [resolvable:$true] %s225_s2 }
  0x10   :  { %205 = vmatpush.bf16.msra.mxu1 %v317_v2  ;;  %v315_v5 = vld [vmem:[#allocation7 + $0x28] sm:$0xff]  ;;  %v306_v6 = vld [vmem:[#allocation5 + $0x20] sm:$0xff]  ;;  %v305_v8 = vld [vmem:[#allocation5 + $0x18] sm:$0xff] }
  0x11   :  { %v314_v7 = vld [vmem:[#allocation7 + $0x20] sm:$0xff]  ;;  %v313_v9 = vld [vmem:[#allocation7 + $0x18] sm:$0xff]  ;;  %v304_v10 = vld [vmem:[#allocation5 + $0x10] sm:$0xff] }
  0x12   :  { %v312_v11 = vld [vmem:[#allocation7 + $0x10] sm:$0xff]  ;;  %v303_v12 = vld [vmem:[#allocation5 + $0x8] sm:$0xff]  ;;  %v302_v14 = vld [vmem:[#allocation5] sm:$0xff] }
  0x13   :  { %127 = vmatpush.bf16.msra.mxu0 %v308_v1  ;;  %v311_v13 = vld [vmem:[#allocation7 + $0x8] sm:$0xff]  ;;  %v60_v15 = vld [vmem:[#allocation2] sm:$0xff]  ;;  %v310_v17 = vld [vmem:[#allocation7] sm:$0xff] }
  0x14   :  { %206 = vmatpush.bf16.msra.mxu1 %v316_v3  ;;  %v61_v16 = vpack.c.bf16 %v60_v15, %v60_v15 }
  0x17   :  { %128 = vmatpush.bf16.msra.mxu0 %v307_v4 }
  0x18   :  { %207 = vmatpush.bf16.msra.mxu1 %v315_v5 }
  0x1b   :  { %129 = vmatpush.bf16.msra.mxu0 %v306_v6 }
  0x1c   :  { %208 = vmatpush.bf16.msra.mxu1 %v314_v7 }
  0x1f   :  { %130 = vmatpush.bf16.msra.mxu0 %v305_v8 }
  0x20   :  { %209 = vmatpush.bf16.msra.mxu1 %v313_v9 }
  0x23   :  { %131 = vmatpush.bf16.msra.mxu0 %v304_v10 }
  0x24   :  { %210 = vmatpush.bf16.msra.mxu1 %v312_v11 }
  0x27   :  { %132 = vmatpush.bf16.msra.mxu0 %v303_v12 }
  0x28   :  { %211 = vmatpush.bf16.msra.mxu1 %v311_v13 }
  0x2b   :  { %133 = vmatpush.bf16.msra.mxu0 %v302_v14 }
  0x2c   :  { %212 = vmatpush.bf16.msra.mxu1 %v310_v17 }
  0x2e   :  { %134 = vmatmul.bf16.vlgmr.msra.gmra.mxu0 %v61_v16 }
  0xab   :  { %v135_v18 = vpop.f32.mrf.mxu0 }
  0xac   :  { %v139_v19 = vmax.f32 %v135_v18, 0.0 }
  0xae   :  { %v140_v20 = vpack.c.bf16 %v139_v19, %v139_v19 }
  0xb0   :  { %213 = vmatmul.bf16.vlgmr.msra.gmra.mxu1 %v140_v20 }
  0xb3   :  { %v137_v21 = vpop.f32.mrf.mxu0 }
 0x12d   :  { %v214_v22 = vpop.f32.mrf.mxu1 }
 0x12e   :  { %v218_v23 = vmax.f32 %v214_v22, 0.0 }
 0x130   :  { %219 = vst [vmem:[#allocation8] sm:$0xff] %v218_v23 }
 0x131   :  { %230 = dma.vmem_to_hbm [thread:$0]  %s226_s2, 128, %s228_s30, [#allocation4]  }
 0x135   :  { %v216_v24 = vpop.f32.mrf.mxu1 }
 0x136   :  { %424 = dma.done.wait [#allocation4], 128  }
 0x137   :  { %425 = vsyncadd [#allocation4], 4294967168 }
 0x138   :  { %235 = vsyncpa [#allocation3], 1 }
 0x139   :  { %236 = vsyncpa [#allocation6], 1 }
 0x13a   :  { %237 = vsyncpa [#allocation4], 1 }

</bundles_post_ra>
